<compile_context>
chip_gen: v6e
topology: v6e:2x2x1
jax: 0.10.0
libtpu: 0.0.40
codegen_flags: <defaults>
</compile_context>

<pallas_src>
import functools

import jax
import jax.numpy as jnp
import numpy as np
from jax.experimental import pallas as pl
from jax.experimental.pallas import tpu as pltpu


# ----------------------------------------------------------------------------
# helpers (plain python, mirrors the PyTorch helper)
# ----------------------------------------------------------------------------
def make_divisible(v, divisor, min_value=None):
    if min_value is None:
        min_value = divisor
    new_v = max(min_value, int(v + divisor / 2) // divisor * divisor)
    if new_v < 0.9 * v:
        new_v += divisor
    return new_v


# ----------------------------------------------------------------------------
# fused whole-network kernel (one grid step = `ips` images packed along lanes)
# ----------------------------------------------------------------------------
def _fused_forward_kernel(x_ref, wm_ref, pww_ref, b_ref, o_ref,
                          *, H, W, ips, chans, cout_final):
    """x_ref:  (ips, C0, HW)          f32 activations (lane axis = H*W)
       wm_ref: (n_blocks*9, Cpad, L)  f32 host-premasked per-tap dw weights
       pww_ref:(n_pw, Rmax, Cmax)     bf16 (or f32) pointwise / conv2 weights
       b_ref:  (n_bias, Bmax, 1)      f32 folded biases
       o_ref:  (ips, Cout, HW)
    """
    HW = H * W
    L = ips * HW

    # Pack the images of this grid step along the lane axis (offsets are
    # multiples of 128 -> pure vreg placement, no cross-lane movement).
    x = jnp.concatenate([x_ref[i].astype(jnp.float32) for i in range(ips)],
                        axis=1)                                   # (C0, L)

    def pointwise(x_in, w, b):
        # 1x1 conv as (Cout,Cin)@(Cin,L) on the MXU; bf16 operands, f32 acc.
        y = jnp.dot(w, x_in.astype(w.dtype),
                    preferred_element_type=jnp.float32)
        return jnp.maximum(y + b, 0.0)

    bias_i = 0
    for blk_i, (cin, cout) in enumerate(chans):
        # ---- depthwise 3x3, stride 1, pad 1 (BN folded), + ReLU -----------
        acc = None
        for tap in range(9):
            dh = tap // 3 - 1
            dw = tap % 3 - 1
            s = dh * W + dw                       # lane shift for this tap
            xs = x if s == 0 else pltpu.roll(x, shift=(-s) % L, axis=1)
            wm = wm_ref[blk_i * 9 + tap][0:cin, :]   # masked weight (cin, L)
            term = xs * wm
            acc = term if acc is None else acc + term
        x = jnp.maximum(acc + b_ref[bias_i][0:cin, :], 0.0)
        bias_i += 1

        # ---- pointwise 1x1 (BN folded) + ReLU -----------------------------
        w = pww_ref[blk_i][0:cout, 0:cin]
        x = pointwise(x, w, b_ref[bias_i][0:cout, :])
        bias_i += 1

    # ---- conv2: 1x1 ConvBNReLU ---------------------------------------------
    cin_last = chans[-1][1]
    w = pww_ref[len(chans)][0:cout_final, 0:cin_last]
    x = pointwise(x, w, b_ref[bias_i][0:cout_final, :])

    # Unpack images back to the per-image output blocks (lane-dense stores).
    for i in range(ips):
        o_ref[i] = x[:, i * HW:(i + 1) * HW].astype(o_ref.dtype)


@functools.partial(jax.jit, static_argnames=("chans", "cout", "images_per_step"))
def _forward_impl(packed, x_nchw, *, chans, cout, images_per_step):
    N, C0, H, W = x_nchw.shape
    HW = H * W
    ips = images_per_step
    assert N % ips == 0, "images_per_step must divide the batch size"
    x = x_nchw.reshape(N, C0, HW)                 # free reshape, NCHW-native

    wm, pww, bias = packed["wm"], packed["pww"], packed["bias"]

    kernel = functools.partial(
        _fused_forward_kernel, H=H, W=W, ips=ips, chans=chans,
        cout_final=cout)

    out = pl.pallas_call(
        kernel,
        out_shape=jax.ShapeDtypeStruct((N, cout, HW), x_nchw.dtype),
        grid=(N // ips,),
        in_specs=[
            pl.BlockSpec((ips, C0, HW), lambda b: (b, 0, 0)),
            pl.BlockSpec(wm.shape, lambda b: (0, 0, 0)),
            pl.BlockSpec(pww.shape, lambda b: (0, 0, 0)),
            pl.BlockSpec(bias.shape, lambda b: (0, 0, 0)),
        ],
        out_specs=pl.BlockSpec((ips, cout, HW), lambda b: (b, 0, 0)),
        compiler_params=pltpu.CompilerParams(
            dimension_semantics=("parallel",)),
    )(x, wm, pww, bias)
    return out.reshape(N, cout, H, W)


def mobilenetv1_forward(packed, meta, x_nchw):
    return _forward_impl(packed, x_nchw, chans=meta["chans"], cout=meta["cout"],
                         images_per_step=meta["images_per_step"])


# ----------------------------------------------------------------------------
# host-side packing: BN-folded params -> 3 kernel buffers
# ----------------------------------------------------------------------------
def pack_for_kernel(folded, H, W, images_per_step, mxu_bf16=True):
    """Precompute per-tap masked depthwise weights and consolidate all small
    parameter arrays into 3 buffers (one-time host work)."""
    HW = H * W
    L = images_per_step * HW
    n_blocks = len(folded["blocks"])

    # Per-tap 3x3 halo validity mask over one image, tiled over packed images.
    h = np.arange(HW) // W
    w = np.arange(HW) % W
    masks = np.zeros((9, HW), np.float32)
    for tap in range(9):
        dh, dw = tap // 3 - 1, tap % 3 - 1
        masks[tap] = ((h + dh >= 0) & (h + dh < H) &
                      (w + dw >= 0) & (w + dw < W)).astype(np.float32)
    masks = np.tile(masks, (1, images_per_step))                  # (9, L)

    # Masked per-tap depthwise weights: wm[blk*9+tap, c, l] = w[c,tap]*mask[tap,l]
    c_dw_max = max(np.asarray(b["dw_w"]).shape[0] for b in folded["blocks"])
    c_pad = max(8, -(-c_dw_max // 8) * 8)
    wm = np.zeros((n_blocks * 9, c_pad, L), np.float32)
    for i, blk in enumerate(folded["blocks"]):
        dw_w = np.asarray(blk["dw_w"])                            # (C, 9)
        C = dw_w.shape[0]
        wm[i * 9:(i + 1) * 9, :C, :] = dw_w.T[:, :, None] * masks[:, None, :]

    # Pointwise / conv2 weights packed into one buffer (zero padded).
    pw_list = ([np.asarray(b["pw_w"]) for b in folded["blocks"]]
               + [np.asarray(folded["conv2"]["w"])])
    rmax = max(a.shape[0] for a in pw_list)
    cmax = max(a.shape[1] for a in pw_list)
    pww = np.zeros((len(pw_list), rmax, cmax), np.float32)
    for i, a in enumerate(pw_list):
        pww[i, :a.shape[0], :a.shape[1]] = a

    # Biases packed into one buffer: [dw_b, pw_b] per block, then conv2 bias.
    b_list = []
    for blk in folded["blocks"]:
        b_list += [np.asarray(blk["dw_b"]), np.asarray(blk["pw_b"])]
    b_list.append(np.asarray(folded["conv2"]["b"]))
    bmax = max(a.shape[0] for a in b_list)
    bias = np.zeros((len(b_list), bmax, 1), np.float32)
    for i, a in enumerate(b_list):
        bias[i, :a.shape[0], :] = a.reshape(-1, 1)

    # Static channel plan.
    chans = []
    cin = int(np.asarray(folded["blocks"][0]["dw_w"]).shape[0])
    for blk in folded["blocks"]:
        cout = int(np.asarray(blk["pw_w"]).shape[0])
        chans.append((cin, cout))
        cin = cout
    cout_final = int(np.asarray(folded["conv2"]["w"]).shape[0])

    packed = {
        "wm": jnp.asarray(wm),
        "pww": jnp.asarray(pww,
                           dtype=jnp.bfloat16 if mxu_bf16 else jnp.float32),
        "bias": jnp.asarray(bias),
    }
    meta = dict(chans=tuple(chans), cout=cout_final,
                images_per_step=images_per_step)
    return packed, meta


# ----------------------------------------------------------------------------
# parameter construction (deterministic, mirrors module __init__ shapes)
# ----------------------------------------------------------------------------
def _bn_params(key, c):
    k1, k2, k3, k4 = jax.random.split(key, 4)
    return dict(gamma=jax.random.uniform(k1, (c,), jnp.float32, 0.5, 1.5),
                beta=0.1 * jax.random.normal(k2, (c,), jnp.float32),
                mean=0.1 * jax.random.normal(k3, (c,), jnp.float32),
                var=jax.random.uniform(k4, (c,), jnp.float32, 0.5, 1.5))


def init_mobilenetv1_params(key, in_channels, out_channels, scale=1.0):
    input_channel = make_divisible(in_channels * scale, 8)
    depth_sep_sizes = [[input_channel, input_channel // 2, 1],
                       [input_channel // 2, input_channel, 1]]

    params = {"blocks": []}
    for (_, o, _) in depth_sep_sizes:
        output_channel = make_divisible(o * scale, 8)
        key, k_dw, k_bn1, k_pw, k_pb, k_bn2 = jax.random.split(key, 6)
        params["blocks"].append({
            # depthwise: PyTorch (C,1,3,3) -> (C,3,3), bias=False
            "dw_w": 0.1 * jax.random.normal(k_dw, (input_channel, 3, 3), jnp.float32),
            "dw_bn": _bn_params(k_bn1, input_channel),
            # pointwise: PyTorch (Cout,Cin,1,1) -> (Cout,Cin), bias=True
            "pw_w": 0.1 * jax.random.normal(k_pw, (output_channel, input_channel), jnp.float32),
            "pw_b": 0.1 * jax.random.normal(k_pb, (output_channel,), jnp.float32),
            "pw_bn": _bn_params(k_bn2, output_channel),
        })
        input_channel = output_channel

    last_channel = make_divisible(out_channels * scale, 8)
    key, k_w, k_bn = jax.random.split(key, 3)
    params["conv2"] = {
        "w": 0.1 * jax.random.normal(k_w, (last_channel, input_channel), jnp.float32),
        "bn": _bn_params(k_bn, last_channel),          # bias=False
    }
    return params


def fold_bn_params(params, eps=1e-5):
    """Fold inference-mode BN into conv weights/bias (done once on the host)."""
    def fold(w, b, bn):
        s = bn["gamma"] / jnp.sqrt(bn["var"] + eps)
        w_f = w * s.reshape((-1,) + (1,) * (w.ndim - 1))
        b_f = s * (b - bn["mean"]) + bn["beta"]
        return w_f, b_f

    out = {"blocks": []}
    for blk in params["blocks"]:
        c = blk["dw_w"].shape[0]
        dw_w, dw_b = fold(blk["dw_w"], jnp.zeros((c,), jnp.float32), blk["dw_bn"])
        pw_w, pw_b = fold(blk["pw_w"], blk["pw_b"], blk["pw_bn"])
        out["blocks"].append({"dw_w": dw_w.reshape(c, 9),
                              "dw_b": dw_b.reshape(c, 1),
                              "pw_w": pw_w,
                              "pw_b": pw_b.reshape(-1, 1)})
    c2 = params["conv2"]
    co = c2["w"].shape[0]
    w2, b2 = fold(c2["w"], jnp.zeros((co,), jnp.float32), c2["bn"])
    out["conv2"] = {"w": w2, "b": b2.reshape(-1, 1)}
    return out


# ----------------------------------------------------------------------------
# pure-JAX f32 reference (same folded params) for a correctness check
# ----------------------------------------------------------------------------
def reference_forward(folded, x_nchw):
    hi = jax.lax.Precision.HIGHEST
    x = x_nchw
    for blk in folded["blocks"]:
        c = blk["dw_w"].shape[0]
        w = blk["dw_w"].reshape(c, 1, 3, 3)
        x = jax.lax.conv_general_dilated(
            x, w, window_strides=(1, 1), padding=((1, 1), (1, 1)),
            feature_group_count=c,
            dimension_numbers=("NCHW", "OIHW", "NCHW"), precision=hi)
        x = jnp.maximum(x + blk["dw_b"].reshape(1, c, 1, 1), 0.0)
        x = jnp.einsum("oc,nchw->nohw", blk["pw_w"], x, precision=hi)
        x = jnp.maximum(x + blk["pw_b"].reshape(1, -1, 1, 1), 0.0)
    c2 = folded["conv2"]
    x = jnp.einsum("oc,nchw->nohw", c2["w"], x, precision=hi)
    return jnp.maximum(x + c2["b"].reshape(1, -1, 1, 1), 0.0)


if __name__ == "__main__":
    in_channels, out_channels, scale = 8, 16, 1.0
    N, H, W = 2, 16, 16

    key = jax.random.PRNGKey(0)
    k_x, k_p = jax.random.split(key)

    # PyTorch-style NCHW input; the kernel consumes it natively (no transpose).
    x_nchw = jax.random.normal(k_x, (N, in_channels, H, W), jnp.float32)

    params = init_mobilenetv1_params(k_p, in_channels, out_channels, scale)
    folded = fold_bn_params(params)

    # images_per_step=N folds the whole batch into the lane axis -> grid=(1,)
    # (best on single-TC v5e/v6e).  Use images_per_step=1 to keep a 2-step
    # "parallel" grid that shards the batch across v7x's two TensorCores.
    packed, meta = pack_for_kernel(folded, H, W, images_per_step=N, mxu_bf16=True)

    out_nchw = mobilenetv1_forward(packed, meta, x_nchw)
    jax.block_until_ready(out_nchw)

    expected_cout = make_divisible(out_channels * scale, 8)
    assert out_nchw.shape == (N, expected_cout, H, W), out_nchw.shape

    # bf16 MXU operands (f32 accumulate) vs. the f32 reference: K<=8, so the
    # error stays well under the loosened 2e-2 tolerance.
    ref = reference_forward(folded, x_nchw)
    np.testing.assert_allclose(np.asarray(out_nchw), np.asarray(ref),
                               rtol=2e-2, atol=2e-2)
    print("KERNEL_OK")
</pallas_src>

<mosaic_0001>
module attributes {stable_mosaic.version = 11 : i64} {
  func.func @_fused_forward_kernel(%arg0: i32, %arg1: memref<2x8x256xf32, #tpu.memory_space<vmem>>, %arg2: memref<18x8x512xf32, #tpu.memory_space<vmem>>, %arg3: memref<3x16x8xbf16, #tpu.memory_space<vmem>>, %arg4: memref<5x16x1xf32, #tpu.memory_space<vmem>>, %arg5: memref<2x16x256xf32, #tpu.memory_space<vmem>>) attributes {dimension_semantics = [#tpu.dimension_semantics<parallel>], iteration_bounds = array<i64: 1>, scalar_prefetch = 0 : i64, scratch_operands = 0 : i64, tpu.core_type = #tpu.core_type<tc>, window_params = [{transform_indices = @transform_0, window_bounds = array<i64: 2, 8, 256>}, {pipeline_mode = #tpu.pipeline_mode<synchronous>, transform_indices = @transform_1, window_bounds = array<i64: 18, 8, 512>}, {pipeline_mode = #tpu.pipeline_mode<synchronous>, transform_indices = @transform_2, window_bounds = array<i64: 3, 16, 8>}, {pipeline_mode = #tpu.pipeline_mode<synchronous>, transform_indices = @transform_3, window_bounds = array<i64: 5, 16, 1>}, {transform_indices = @transform_4, window_bounds = array<i64: 2, 16, 256>}]} {
    %c0 = arith.constant 0 : index
    %c0_0 = arith.constant 0 : index
    %c0_1 = arith.constant 0 : index
    %0 = vector.load %arg1[%c0, %c0_0, %c0_1] : memref<2x8x256xf32, #tpu.memory_space<vmem>>, vector<1x8x256xf32>
    %1 = vector.shape_cast %0 : vector<1x8x256xf32> to vector<8x256xf32>
    %c1 = arith.constant 1 : index
    %c0_2 = arith.constant 0 : index
    %c0_3 = arith.constant 0 : index
    %2 = vector.load %arg1[%c1, %c0_2, %c0_3] : memref<2x8x256xf32, #tpu.memory_space<vmem>>, vector<1x8x256xf32>
    %3 = vector.shape_cast %2 : vector<1x8x256xf32> to vector<8x256xf32>
    %4 = tpu.concatenate %1, %3 in 1 : vector<8x256xf32>, vector<8x256xf32> -> vector<8x512xf32>
    %c17_i32 = arith.constant 17 : i32
    %5 = tpu.dynamic_rotate %4 by %c17_i32 dim 1 : vector<8x512xf32>, i32 -> vector<8x512xf32>
    %c0_4 = arith.constant 0 : index
    %c0_5 = arith.constant 0 : index
    %c0_6 = arith.constant 0 : index
    %6 = vector.load %arg2[%c0_4, %c0_5, %c0_6] : memref<18x8x512xf32, #tpu.memory_space<vmem>>, vector<1x8x512xf32>
    %7 = vector.shape_cast %6 : vector<1x8x512xf32> to vector<8x512xf32>
    %8 = arith.mulf %5, %7 : vector<8x512xf32>
    %c16_i32 = arith.constant 16 : i32
    %9 = tpu.dynamic_rotate %4 by %c16_i32 dim 1 : vector<8x512xf32>, i32 -> vector<8x512xf32>
    %c1_7 = arith.constant 1 : index
    %c0_8 = arith.constant 0 : index
    %c0_9 = arith.constant 0 : index
    %10 = vector.load %arg2[%c1_7, %c0_8, %c0_9] : memref<18x8x512xf32, #tpu.memory_space<vmem>>, vector<1x8x512xf32>
    %11 = vector.shape_cast %10 : vector<1x8x512xf32> to vector<8x512xf32>
    %12 = arith.mulf %9, %11 : vector<8x512xf32>
    %13 = arith.addf %8, %12 : vector<8x512xf32>
    %c15_i32 = arith.constant 15 : i32
    %14 = tpu.dynamic_rotate %4 by %c15_i32 dim 1 : vector<8x512xf32>, i32 -> vector<8x512xf32>
    %c2 = arith.constant 2 : index
    %c0_10 = arith.constant 0 : index
    %c0_11 = arith.constant 0 : index
    %15 = vector.load %arg2[%c2, %c0_10, %c0_11] : memref<18x8x512xf32, #tpu.memory_space<vmem>>, vector<1x8x512xf32>
    %16 = vector.shape_cast %15 : vector<1x8x512xf32> to vector<8x512xf32>
    %17 = arith.mulf %14, %16 : vector<8x512xf32>
    %18 = arith.addf %13, %17 : vector<8x512xf32>
    %c1_i32 = arith.constant 1 : i32
    %19 = tpu.dynamic_rotate %4 by %c1_i32 dim 1 : vector<8x512xf32>, i32 -> vector<8x512xf32>
    %c3 = arith.constant 3 : index
    %c0_12 = arith.constant 0 : index
    %c0_13 = arith.constant 0 : index
    %20 = vector.load %arg2[%c3, %c0_12, %c0_13] : memref<18x8x512xf32, #tpu.memory_space<vmem>>, vector<1x8x512xf32>
    %21 = vector.shape_cast %20 : vector<1x8x512xf32> to vector<8x512xf32>
    %22 = arith.mulf %19, %21 : vector<8x512xf32>
    %23 = arith.addf %18, %22 : vector<8x512xf32>
    %c4 = arith.constant 4 : index
    %c0_14 = arith.constant 0 : index
    %c0_15 = arith.constant 0 : index
    %24 = vector.load %arg2[%c4, %c0_14, %c0_15] : memref<18x8x512xf32, #tpu.memory_space<vmem>>, vector<1x8x512xf32>
    %25 = vector.shape_cast %24 : vector<1x8x512xf32> to vector<8x512xf32>
    %26 = arith.mulf %4, %25 : vector<8x512xf32>
    %27 = arith.addf %23, %26 : vector<8x512xf32>
    %c511_i32 = arith.constant 511 : i32
    %28 = tpu.dynamic_rotate %4 by %c511_i32 dim 1 : vector<8x512xf32>, i32 -> vector<8x512xf32>
    %c5 = arith.constant 5 : index
    %c0_16 = arith.constant 0 : index
    %c0_17 = arith.constant 0 : index
    %29 = vector.load %arg2[%c5, %c0_16, %c0_17] : memref<18x8x512xf32, #tpu.memory_space<vmem>>, vector<1x8x512xf32>
    %30 = vector.shape_cast %29 : vector<1x8x512xf32> to vector<8x512xf32>
    %31 = arith.mulf %28, %30 : vector<8x512xf32>
    %32 = arith.addf %27, %31 : vector<8x512xf32>
    %c497_i32 = arith.constant 497 : i32
    %33 = tpu.dynamic_rotate %4 by %c497_i32 dim 1 : vector<8x512xf32>, i32 -> vector<8x512xf32>
    %c6 = arith.constant 6 : index
    %c0_18 = arith.constant 0 : index
    %c0_19 = arith.constant 0 : index
    %34 = vector.load %arg2[%c6, %c0_18, %c0_19] : memref<18x8x512xf32, #tpu.memory_space<vmem>>, vector<1x8x512xf32>
    %35 = vector.shape_cast %34 : vector<1x8x512xf32> to vector<8x512xf32>
    %36 = arith.mulf %33, %35 : vector<8x512xf32>
    %37 = arith.addf %32, %36 : vector<8x512xf32>
    %c496_i32 = arith.constant 496 : i32
    %38 = tpu.dynamic_rotate %4 by %c496_i32 dim 1 : vector<8x512xf32>, i32 -> vector<8x512xf32>
    %c7 = arith.constant 7 : index
    %c0_20 = arith.constant 0 : index
    %c0_21 = arith.constant 0 : index
    %39 = vector.load %arg2[%c7, %c0_20, %c0_21] : memref<18x8x512xf32, #tpu.memory_space<vmem>>, vector<1x8x512xf32>
    %40 = vector.shape_cast %39 : vector<1x8x512xf32> to vector<8x512xf32>
    %41 = arith.mulf %38, %40 : vector<8x512xf32>
    %42 = arith.addf %37, %41 : vector<8x512xf32>
    %c495_i32 = arith.constant 495 : i32
    %43 = tpu.dynamic_rotate %4 by %c495_i32 dim 1 : vector<8x512xf32>, i32 -> vector<8x512xf32>
    %c8 = arith.constant 8 : index
    %c0_22 = arith.constant 0 : index
    %c0_23 = arith.constant 0 : index
    %44 = vector.load %arg2[%c8, %c0_22, %c0_23] : memref<18x8x512xf32, #tpu.memory_space<vmem>>, vector<1x8x512xf32>
    %45 = vector.shape_cast %44 : vector<1x8x512xf32> to vector<8x512xf32>
    %46 = arith.mulf %43, %45 : vector<8x512xf32>
    %47 = arith.addf %42, %46 : vector<8x512xf32>
    %c0_24 = arith.constant 0 : index
    %c0_25 = arith.constant 0 : index
    %c0_26 = arith.constant 0 : index
    %48 = vector.load %arg4[%c0_24, %c0_25, %c0_26] : memref<5x16x1xf32, #tpu.memory_space<vmem>>, vector<1x16x1xf32>
    %49 = vector.shape_cast %48 : vector<1x16x1xf32> to vector<16x1xf32>
    %50 = vector.extract_strided_slice %49 {offsets = [0, 0], sizes = [8, 1], strides = [1, 1]} : vector<16x1xf32> to vector<8x1xf32>
    %51 = vector.broadcast %50 : vector<8x1xf32> to vector<8x512xf32>
    %52 = arith.addf %47, %51 : vector<8x512xf32>
    %cst = arith.constant 0.000000e+00 : f32
    %53 = vector.broadcast %cst : f32 to vector<8x512xf32>
    %54 = arith.maximumf %52, %53 : vector<8x512xf32>
    %c0_27 = arith.constant 0 : index
    %c0_28 = arith.constant 0 : index
    %c0_29 = arith.constant 0 : index
    %55 = vector.load %arg3[%c0_27, %c0_28, %c0_29] : memref<3x16x8xbf16, #tpu.memory_space<vmem>>, vector<1x16x8xbf16>
    %56 = vector.shape_cast %55 : vector<1x16x8xbf16> to vector<16x8xbf16>
    %57 = vector.extract_strided_slice %56 {offsets = [0, 0], sizes = [8, 8], strides = [1, 1]} : vector<16x8xbf16> to vector<8x8xbf16>
    %c1_30 = arith.constant 1 : index
    %c0_31 = arith.constant 0 : index
    %c0_32 = arith.constant 0 : index
    %58 = vector.load %arg4[%c1_30, %c0_31, %c0_32] : memref<5x16x1xf32, #tpu.memory_space<vmem>>, vector<1x16x1xf32>
    %59 = vector.shape_cast %58 : vector<1x16x1xf32> to vector<16x1xf32>
    %60 = vector.extract_strided_slice %59 {offsets = [0, 0], sizes = [8, 1], strides = [1, 1]} : vector<16x1xf32> to vector<8x1xf32>
    %61 = arith.truncf %54 : vector<8x512xf32> to vector<8x512xbf16>
    %cst_33 = arith.constant dense<0.000000e+00> : vector<8x512xf32>
    %62 = tpu.matmul %57, %61, %cst_33 {dimension_numbers = #tpu.dot_dimension_numbers<[1], [0], [0], [1], [0, 0, 1, 1], [], []>} : vector<8x8xbf16>, vector<8x512xbf16>, vector<8x512xf32> -> vector<8x512xf32>
    %63 = vector.broadcast %60 : vector<8x1xf32> to vector<8x512xf32>
    %64 = arith.addf %62, %63 : vector<8x512xf32>
    %cst_34 = arith.constant 0.000000e+00 : f32
    %65 = vector.broadcast %cst_34 : f32 to vector<8x512xf32>
    %66 = arith.maximumf %64, %65 : vector<8x512xf32>
    %c17_i32_35 = arith.constant 17 : i32
    %67 = tpu.dynamic_rotate %66 by %c17_i32_35 dim 1 : vector<8x512xf32>, i32 -> vector<8x512xf32>
    %c9 = arith.constant 9 : index
    %c0_36 = arith.constant 0 : index
    %c0_37 = arith.constant 0 : index
    %68 = vector.load %arg2[%c9, %c0_36, %c0_37] : memref<18x8x512xf32, #tpu.memory_space<vmem>>, vector<1x8x512xf32>
    %69 = vector.shape_cast %68 : vector<1x8x512xf32> to vector<8x512xf32>
    %70 = arith.mulf %67, %69 : vector<8x512xf32>
    %c16_i32_38 = arith.constant 16 : i32
    %71 = tpu.dynamic_rotate %66 by %c16_i32_38 dim 1 : vector<8x512xf32>, i32 -> vector<8x512xf32>
    %c10 = arith.constant 10 : index
    %c0_39 = arith.constant 0 : index
    %c0_40 = arith.constant 0 : index
    %72 = vector.load %arg2[%c10, %c0_39, %c0_40] : memref<18x8x512xf32, #tpu.memory_space<vmem>>, vector<1x8x512xf32>
    %73 = vector.shape_cast %72 : vector<1x8x512xf32> to vector<8x512xf32>
    %74 = arith.mulf %71, %73 : vector<8x512xf32>
    %75 = arith.addf %70, %74 : vector<8x512xf32>
    %c15_i32_41 = arith.constant 15 : i32
    %76 = tpu.dynamic_rotate %66 by %c15_i32_41 dim 1 : vector<8x512xf32>, i32 -> vector<8x512xf32>
    %c11 = arith.constant 11 : index
    %c0_42 = arith.constant 0 : index
    %c0_43 = arith.constant 0 : index
    %77 = vector.load %arg2[%c11, %c0_42, %c0_43] : memref<18x8x512xf32, #tpu.memory_space<vmem>>, vector<1x8x512xf32>
    %78 = vector.shape_cast %77 : vector<1x8x512xf32> to vector<8x512xf32>
    %79 = arith.mulf %76, %78 : vector<8x512xf32>
    %80 = arith.addf %75, %79 : vector<8x512xf32>
    %c1_i32_44 = arith.constant 1 : i32
    %81 = tpu.dynamic_rotate %66 by %c1_i32_44 dim 1 : vector<8x512xf32>, i32 -> vector<8x512xf32>
    %c12 = arith.constant 12 : index
    %c0_45 = arith.constant 0 : index
    %c0_46 = arith.constant 0 : index
    %82 = vector.load %arg2[%c12, %c0_45, %c0_46] : memref<18x8x512xf32, #tpu.memory_space<vmem>>, vector<1x8x512xf32>
    %83 = vector.shape_cast %82 : vector<1x8x512xf32> to vector<8x512xf32>
    %84 = arith.mulf %81, %83 : vector<8x512xf32>
    %85 = arith.addf %80, %84 : vector<8x512xf32>
    %c13 = arith.constant 13 : index
    %c0_47 = arith.constant 0 : index
    %c0_48 = arith.constant 0 : index
    %86 = vector.load %arg2[%c13, %c0_47, %c0_48] : memref<18x8x512xf32, #tpu.memory_space<vmem>>, vector<1x8x512xf32>
    %87 = vector.shape_cast %86 : vector<1x8x512xf32> to vector<8x512xf32>
    %88 = arith.mulf %66, %87 : vector<8x512xf32>
    %89 = arith.addf %85, %88 : vector<8x512xf32>
    %c511_i32_49 = arith.constant 511 : i32
    %90 = tpu.dynamic_rotate %66 by %c511_i32_49 dim 1 : vector<8x512xf32>, i32 -> vector<8x512xf32>
    %c14 = arith.constant 14 : index
    %c0_50 = arith.constant 0 : index
    %c0_51 = arith.constant 0 : index
    %91 = vector.load %arg2[%c14, %c0_50, %c0_51] : memref<18x8x512xf32, #tpu.memory_space<vmem>>, vector<1x8x512xf32>
    %92 = vector.shape_cast %91 : vector<1x8x512xf32> to vector<8x512xf32>
    %93 = arith.mulf %90, %92 : vector<8x512xf32>
    %94 = arith.addf %89, %93 : vector<8x512xf32>
    %c497_i32_52 = arith.constant 497 : i32
    %95 = tpu.dynamic_rotate %66 by %c497_i32_52 dim 1 : vector<8x512xf32>, i32 -> vector<8x512xf32>
    %c15 = arith.constant 15 : index
    %c0_53 = arith.constant 0 : index
    %c0_54 = arith.constant 0 : index
    %96 = vector.load %arg2[%c15, %c0_53, %c0_54] : memref<18x8x512xf32, #tpu.memory_space<vmem>>, vector<1x8x512xf32>
    %97 = vector.shape_cast %96 : vector<1x8x512xf32> to vector<8x512xf32>
    %98 = arith.mulf %95, %97 : vector<8x512xf32>
    %99 = arith.addf %94, %98 : vector<8x512xf32>
    %c496_i32_55 = arith.constant 496 : i32
    %100 = tpu.dynamic_rotate %66 by %c496_i32_55 dim 1 : vector<8x512xf32>, i32 -> vector<8x512xf32>
    %c16 = arith.constant 16 : index
    %c0_56 = arith.constant 0 : index
    %c0_57 = arith.constant 0 : index
    %101 = vector.load %arg2[%c16, %c0_56, %c0_57] : memref<18x8x512xf32, #tpu.memory_space<vmem>>, vector<1x8x512xf32>
    %102 = vector.shape_cast %101 : vector<1x8x512xf32> to vector<8x512xf32>
    %103 = arith.mulf %100, %102 : vector<8x512xf32>
    %104 = arith.addf %99, %103 : vector<8x512xf32>
    %c495_i32_58 = arith.constant 495 : i32
    %105 = tpu.dynamic_rotate %66 by %c495_i32_58 dim 1 : vector<8x512xf32>, i32 -> vector<8x512xf32>
    %c17 = arith.constant 17 : index
    %c0_59 = arith.constant 0 : index
    %c0_60 = arith.constant 0 : index
    %106 = vector.load %arg2[%c17, %c0_59, %c0_60] : memref<18x8x512xf32, #tpu.memory_space<vmem>>, vector<1x8x512xf32>
    %107 = vector.shape_cast %106 : vector<1x8x512xf32> to vector<8x512xf32>
    %108 = arith.mulf %105, %107 : vector<8x512xf32>
    %109 = arith.addf %104, %108 : vector<8x512xf32>
    %c2_61 = arith.constant 2 : index
    %c0_62 = arith.constant 0 : index
    %c0_63 = arith.constant 0 : index
    %110 = vector.load %arg4[%c2_61, %c0_62, %c0_63] : memref<5x16x1xf32, #tpu.memory_space<vmem>>, vector<1x16x1xf32>
    %111 = vector.shape_cast %110 : vector<1x16x1xf32> to vector<16x1xf32>
    %112 = vector.extract_strided_slice %111 {offsets = [0, 0], sizes = [8, 1], strides = [1, 1]} : vector<16x1xf32> to vector<8x1xf32>
    %113 = vector.broadcast %112 : vector<8x1xf32> to vector<8x512xf32>
    %114 = arith.addf %109, %113 : vector<8x512xf32>
    %cst_64 = arith.constant 0.000000e+00 : f32
    %115 = vector.broadcast %cst_64 : f32 to vector<8x512xf32>
    %116 = arith.maximumf %114, %115 : vector<8x512xf32>
    %c1_65 = arith.constant 1 : index
    %c0_66 = arith.constant 0 : index
    %c0_67 = arith.constant 0 : index
    %117 = vector.load %arg3[%c1_65, %c0_66, %c0_67] : memref<3x16x8xbf16, #tpu.memory_space<vmem>>, vector<1x16x8xbf16>
    %118 = vector.shape_cast %117 : vector<1x16x8xbf16> to vector<16x8xbf16>
    %119 = vector.extract_strided_slice %118 {offsets = [0, 0], sizes = [8, 8], strides = [1, 1]} : vector<16x8xbf16> to vector<8x8xbf16>
    %c3_68 = arith.constant 3 : index
    %c0_69 = arith.constant 0 : index
    %c0_70 = arith.constant 0 : index
    %120 = vector.load %arg4[%c3_68, %c0_69, %c0_70] : memref<5x16x1xf32, #tpu.memory_space<vmem>>, vector<1x16x1xf32>
    %121 = vector.shape_cast %120 : vector<1x16x1xf32> to vector<16x1xf32>
    %122 = vector.extract_strided_slice %121 {offsets = [0, 0], sizes = [8, 1], strides = [1, 1]} : vector<16x1xf32> to vector<8x1xf32>
    %123 = arith.truncf %116 : vector<8x512xf32> to vector<8x512xbf16>
    %cst_71 = arith.constant dense<0.000000e+00> : vector<8x512xf32>
    %124 = tpu.matmul %119, %123, %cst_71 {dimension_numbers = #tpu.dot_dimension_numbers<[1], [0], [0], [1], [0, 0, 1, 1], [], []>} : vector<8x8xbf16>, vector<8x512xbf16>, vector<8x512xf32> -> vector<8x512xf32>
    %125 = vector.broadcast %122 : vector<8x1xf32> to vector<8x512xf32>
    %126 = arith.addf %124, %125 : vector<8x512xf32>
    %cst_72 = arith.constant 0.000000e+00 : f32
    %127 = vector.broadcast %cst_72 : f32 to vector<8x512xf32>
    %128 = arith.maximumf %126, %127 : vector<8x512xf32>
    %c2_73 = arith.constant 2 : index
    %c0_74 = arith.constant 0 : index
    %c0_75 = arith.constant 0 : index
    %129 = vector.load %arg3[%c2_73, %c0_74, %c0_75] : memref<3x16x8xbf16, #tpu.memory_space<vmem>>, vector<1x16x8xbf16>
    %130 = vector.shape_cast %129 : vector<1x16x8xbf16> to vector<16x8xbf16>
    %c4_76 = arith.constant 4 : index
    %c0_77 = arith.constant 0 : index
    %c0_78 = arith.constant 0 : index
    %131 = vector.load %arg4[%c4_76, %c0_77, %c0_78] : memref<5x16x1xf32, #tpu.memory_space<vmem>>, vector<1x16x1xf32>
    %132 = vector.shape_cast %131 : vector<1x16x1xf32> to vector<16x1xf32>
    %133 = arith.truncf %128 : vector<8x512xf32> to vector<8x512xbf16>
    %cst_79 = arith.constant dense<0.000000e+00> : vector<16x512xf32>
    %134 = tpu.matmul %130, %133, %cst_79 {dimension_numbers = #tpu.dot_dimension_numbers<[1], [0], [0], [1], [0, 0, 1, 1], [], []>} : vector<16x8xbf16>, vector<8x512xbf16>, vector<16x512xf32> -> vector<16x512xf32>
    %135 = vector.broadcast %132 : vector<16x1xf32> to vector<16x512xf32>
    %136 = arith.addf %134, %135 : vector<16x512xf32>
    %cst_80 = arith.constant 0.000000e+00 : f32
    %137 = vector.broadcast %cst_80 : f32 to vector<16x512xf32>
    %138 = arith.maximumf %136, %137 : vector<16x512xf32>
    %139 = vector.extract_strided_slice %138 {offsets = [0, 0], sizes = [16, 256], strides = [1, 1]} : vector<16x512xf32> to vector<16x256xf32>
    %c0_81 = arith.constant 0 : index
    %c0_82 = arith.constant 0 : index
    %c0_83 = arith.constant 0 : index
    %140 = vector.load %arg5[%c0_81, %c0_82, %c0_83] : memref<2x16x256xf32, #tpu.memory_space<vmem>>, vector<1x16x256xf32>
    %141 = vector.shape_cast %140 : vector<1x16x256xf32> to vector<16x256xf32>
    %142 = vector.shape_cast %139 : vector<16x256xf32> to vector<1x16x256xf32>
    tpu.vector_store %arg5[%c0_81, %c0_82, %c0_83], %142 {strides = array<i32>} : memref<2x16x256xf32, #tpu.memory_space<vmem>>, vector<1x16x256xf32>,
    %143 = vector.extract_strided_slice %138 {offsets = [0, 256], sizes = [16, 256], strides = [1, 1]} : vector<16x512xf32> to vector<16x256xf32>
    %c1_84 = arith.constant 1 : index
    %c0_85 = arith.constant 0 : index
    %c0_86 = arith.constant 0 : index
    %144 = vector.load %arg5[%c1_84, %c0_85, %c0_86] : memref<2x16x256xf32, #tpu.memory_space<vmem>>, vector<1x16x256xf32>
    %145 = vector.shape_cast %144 : vector<1x16x256xf32> to vector<16x256xf32>
    %146 = vector.shape_cast %143 : vector<16x256xf32> to vector<1x16x256xf32>
    tpu.vector_store %arg5[%c1_84, %c0_85, %c0_86], %146 {strides = array<i32>} : memref<2x16x256xf32, #tpu.memory_space<vmem>>, vector<1x16x256xf32>,
    return
  }
  func.func @transform_0(%arg0: i32) -> (i32, i32, i32) {
    %c0_i32 = arith.constant 0 : i32
    %c0_i32_0 = arith.constant 0 : i32
    %c0_i32_1 = arith.constant 0 : i32
    return %arg0, %c0_i32, %c0_i32_0 : i32, i32, i32
  }
  func.func @transform_1(%arg0: i32) -> (i32, i32, i32) {
    %c0_i32 = arith.constant 0 : i32
    %c0_i32_0 = arith.constant 0 : i32
    %c0_i32_1 = arith.constant 0 : i32
    %c0_i32_2 = arith.constant 0 : i32
    return %c0_i32, %c0_i32_0, %c0_i32_1 : i32, i32, i32
  }
  func.func @transform_2(%arg0: i32) -> (i32, i32, i32) {
    %c0_i32 = arith.constant 0 : i32
    %c0_i32_0 = arith.constant 0 : i32
    %c0_i32_1 = arith.constant 0 : i32
    %c0_i32_2 = arith.constant 0 : i32
    return %c0_i32, %c0_i32_0, %c0_i32_1 : i32, i32, i32
  }
  func.func @transform_3(%arg0: i32) -> (i32, i32, i32) {
    %c0_i32 = arith.constant 0 : i32
    %c0_i32_0 = arith.constant 0 : i32
    %c0_i32_1 = arith.constant 0 : i32
    %c0_i32_2 = arith.constant 0 : i32
    return %c0_i32, %c0_i32_0, %c0_i32_1 : i32, i32, i32
  }
  func.func @transform_4(%arg0: i32) -> (i32, i32, i32) {
    %c0_i32 = arith.constant 0 : i32
    %c0_i32_0 = arith.constant 0 : i32
    %c0_i32_1 = arith.constant 0 : i32
    return %arg0, %c0_i32, %c0_i32_0 : i32, i32, i32
  }
}

</mosaic_0001>

<bundles_post_ra>
// kernel: _forward_impl.1
= control target key start
LH: loop header
LB: loop body
LE: loop exit
PB: predicated region body
PF: predicated region fallthrough
CT: control target
= control target key end

     0   :  { %9 = vsyncpa [#allocation3], 0  ;;  %s934_s15 = smov [#allocation2]   ;;  %s1429_s0 = inlined_call_operand.vmem [shape: f32[2,8,256], index: 0, kind: input, shape index: {}]   ;;  %s1430_s1 = inlined_call_operand.hbm [shape: f32[18,8,512], index: 1, kind: input, shape index: {}]   ;;  %s1431_s2 = inlined_call_operand.vmem [shape: bf16[3,16,8], index: 2, kind: input, shape index: {}]   ;;  %s1432_s3 = inlined_call_operand.vmem [shape: f32[5,16,1], index: 3, kind: input, shape index: {}]   ;;  %s1433_s4 = inlined_call_operand.vmem [shape: f32[2,16,256], index: 4, kind: output, shape index: {}]  }
   0x1   :  { %s17_s16 = sshll.u32 %s934_s15, 4  ;;  %s18_s16 = int_to_ptr.vmem [resolvable:$true] %s17_s16 }
   0x2   :  { %s920_s17 = scalar_lea.vmem %s18_s16, 9216  ;;  %p925_p1 = scmp.lt.s32.totalorder %s18_s16, %s18_s16 }
   0x3   :  { %p921_p0 = scmp.ne.s32.totalorder %s18_s16, %s920_s17  ;;  %p926_p2 = scmp.lt.s32.totalorder %s920_s17, %s920_s17 }
   0x5   :  { %p927_p3 = por %p926_p2, %p925_p1 }
   0x7   :  { %p928_p4 = pnand %p927_p3, %p921_p0 }
   0x9   :  { %931 = shalt.err (!%p928_p4)
}
   0xa   :  { %s935_s18 = smov 512   ;;  %s936_s19 = smov 32  }
   0xb   :  { %23 = dma.hbm_to_vmem [thread:$0]  %s1430_s1, 9216, %s18_s16, [#allocation3], %s935_s18, %s935_s18, %s936_s19  }
   0xc   :  { %932 = dma.done.wait [#allocation3], 9216  }
   0xd   :  { %933 = vsyncadd [#allocation3], 4294958080  ;;  %v937_v0 = vmov 0   ;;  %v981_v1 = vld [vmem:[%s1429_s0 + $0x10] sm:$0xff]  ;;  %v986_v2 = vld [vmem:[%s1429_s0] sm:$0xff]  ;;  %s938_s1 = smov 17   ;;  %v45_v23 = vlaneseq }
   0xe   :  { %909 = vset.pattern.permute.xlu0 %v937_v0  ;;  %330 = vmatprep.mubr.bf16.mxu0 %v937_v0  ;;  %v995_v3 = vld [vmem:[%s1429_s0 + $0x18] sm:$0xff]  ;;  %v1000_v4 = vld [vmem:[%s1429_s0 + $0x8] sm:$0xff]  ;;  %s939_s30 = smov 16   ;;  %s940_s0 = smov 15   ;;  %v255_v5 = vld [vmem:[%s1432_s3] sm:$0xff]  ;;  %vm285_vm8 = vcmask 1043456  }
   0xf   :  { %371 = vmatprep.mubr.bf16.mxu1 %v937_v0  ;;  %910 = vset.pattern.permute.xlu1 %v937_v0  ;;  %s941_s5 = smov 1   ;;  %s942_s6 = smov 127   ;;  %v872_v6 = vld [vmem:[%s1432_s3 + $0x10] sm:$0xff]  ;;  %v1072_v26 = vand.u32 127, %v45_v23  ;;  %v52_v31 = vld [vmem:[#allocation2] sm:$0xff]  ;;  %v55_v32 = vld [vmem:[#allocation2 + $0x18] sm:$0xff] }
  0x10   :  { %41 = vrot.lane.b32.xlu1 %v981_v1, %s938_s1  ;;  %37 = vrot.lane.b32.xlu0 %v986_v2, %s938_s1  ;;  %s943_s7 = smov 113   ;;  %s944_s8 = smov 112   ;;  %v74_v34 = vld [vmem:[#allocation2 + $0x20] sm:$0xff]  ;;  %v75_v37 = vld [vmem:[#allocation2 + $0x28] sm:$0xff]  ;;  %v76_v39 = vld [vmem:[#allocation2 + $0x30] sm:$0xff]  ;;  %vm281_vm9 = vcmask 64512  }
  0x11   :  { %s945_s9 = smov 111   ;;  %vm47_vm0 = vcmp.lt.s32.totalorder %v1072_v26, 17  ;;  %vm68_vm1 = vcmp.lt.s32.totalorder %v1072_v26, 16  ;;  %v77_v40 = vld [vmem:[#allocation2 + $0x38] sm:$0xff]  ;;  %vm94_vm2 = vcmp.lt.s32.totalorder %v1072_v26, 15  ;;  %vm120_vm3 = vcmp.lt.s32.totalorder %v1072_v26, 1 }
  0x12   :  { %v53_v47 = vld [vmem:[#allocation2 + $0x8] sm:$0xff]  ;;  %v54_v48 = vld [vmem:[#allocation2 + $0x10] sm:$0xff]  ;;  %v100_v51 = vld [vmem:[#allocation2 + $0x40] sm:$0xff]  ;;  %vm159_vm4 = vcmp.lt.s32.totalorder %v1072_v26, 127  ;;  %vm185_vm5 = vcmp.lt.s32.totalorder %v1072_v26, 113  ;;  %vm211_vm6 = vcmp.lt.s32.totalorder %v1072_v26, 112 }
  0x13   :  { %v101_v57 = vld [vmem:[#allocation2 + $0x48] sm:$0xff]  ;;  %v102_v59 = vld [vmem:[#allocation2 + $0x50] sm:$0xff]  ;;  %v103_v60 = vld [vmem:[#allocation2 + $0x58] sm:$0xff]  ;;  %vm237_vm7 = vcmp.lt.s32.totalorder %v1072_v26, 111 }
  0x14   :  { %43 = vrot.lane.b32.xlu1 %v995_v3, %s938_s1  ;;  %39 = vrot.lane.b32.xlu0 %v1000_v4, %s938_s1  ;;  %v126_v63 = vld [vmem:[#allocation2 + $0x60] sm:$0xff] }
  0x18   :  { %62 = vrot.lane.b32.xlu1 %v1000_v4, %s939_s30  ;;  %60 = vrot.lane.b32.xlu0 %v986_v2, %s939_s30 }
  0x1c   :  { %66 = vrot.lane.b32.xlu1 %v995_v3, %s939_s30  ;;  %64 = vrot.lane.b32.xlu0 %v981_v1, %s939_s30 }
  0x20   :  { %88 = vrot.lane.b32.xlu1 %v1000_v4, %s940_s0  ;;  %86 = vrot.lane.b32.xlu0 %v986_v2, %s940_s0 }
  0x24   :  { %92 = vrot.lane.b32.xlu1 %v995_v3, %s940_s0  ;;  %90 = vrot.lane.b32.xlu0 %v981_v1, %s940_s0 }
  0x28   :  { %114 = vrot.lane.b32.xlu1 %v1000_v4, %s941_s5  ;;  %112 = vrot.lane.b32.xlu0 %v986_v2, %s941_s5 }
  0x2c   :  { %118 = vrot.lane.b32.xlu1 %v995_v3, %s941_s5  ;;  %116 = vrot.lane.b32.xlu0 %v981_v1, %s941_s5 }
  0x30   :  { %153 = vrot.lane.b32.xlu1 %v1000_v4, %s942_s6  ;;  %151 = vrot.lane.b32.xlu0 %v986_v2, %s942_s6 }
  0x34   :  { %157 = vrot.lane.b32.xlu1 %v995_v3, %s942_s6  ;;  %155 = vrot.lane.b32.xlu0 %v981_v1, %s942_s6 }
  0x38   :  { %179 = vrot.lane.b32.xlu1 %v1000_v4, %s943_s7  ;;  %177 = vrot.lane.b32.xlu0 %v986_v2, %s943_s7 }
  0x3c   :  { %183 = vrot.lane.b32.xlu1 %v995_v3, %s943_s7  ;;  %181 = vrot.lane.b32.xlu0 %v981_v1, %s943_s7 }
  0x40   :  { %205 = vrot.lane.b32.xlu1 %v1000_v4, %s944_s8  ;;  %203 = vrot.lane.b32.xlu0 %v986_v2, %s944_s8 }
  0x44   :  { %209 = vrot.lane.b32.xlu1 %v995_v3, %s944_s8  ;;  %207 = vrot.lane.b32.xlu0 %v981_v1, %s944_s8 }
  0x48   :  { %231 = vrot.lane.b32.xlu1 %v1000_v4, %s945_s9  ;;  %229 = vrot.lane.b32.xlu0 %v986_v2, %s945_s9 }
  0x4c   :  { %235 = vrot.lane.b32.xlu1 %v995_v3, %s945_s9  ;;  %233 = vrot.lane.b32.xlu0 %v981_v1, %s945_s9 }
  0x50   :  { %258 = vperm.xlu0 %909, %v255_v5   ;;  %278 = vperm.xlu1 %910, %v872_v6  }
  0x82   :  { %v42_v7 = vpop.permute.xlu1 %41  ;;  %v38_v8 = vpop.permute.xlu0 %37 }
  0x86   :  { %v44_v9 = vpop.permute.xlu1 %43  ;;  %v40_v10 = vpop.permute.xlu0 %39 }
  0x87   :  { %v51_v33 = vsel %vm47_vm0, %v44_v9, %v38_v8  ;;  %v48_v36 = vsel %vm47_vm0, %v42_v7, %v44_v9  ;;  %v49_v43 = vsel %vm47_vm0, %v40_v10, %v42_v7  ;;  %v50_v49 = vsel %vm47_vm0, %v38_v8, %v40_v10 }
  0x88   :  { %v56_v46 = vmul.f32 %v52_v31, %v51_v33  ;;  %v59_v53 = vmul.f32 %v55_v32, %v48_v36  ;;  %v57_v6 = vmul.f32 %v53_v47, %v50_v49  ;;  %v58_v7 = vmul.f32 %v54_v48, %v49_v43  ;;  %v139_v33 = vld [vmem:[#allocation2 + $0x80] sm:$0xff] }
  0x8a   :  { %v63_v11 = vpop.permute.xlu1 %62  ;;  %v61_v12 = vpop.permute.xlu0 %60 }
  0x8b   :  { %v71_v38 = vsel %vm68_vm1, %v61_v12, %v63_v11 }
  0x8c   :  { %v79_v54 = vmul.f32 %v75_v37, %v71_v38 }
  0x8e   :  { %v67_v13 = vpop.permute.xlu1 %66  ;;  %v65_v14 = vpop.permute.xlu0 %64 }
  0x8f   :  { %v72_v35 = vsel %vm68_vm1, %v67_v13, %v61_v12  ;;  %v69_v41 = vsel %vm68_vm1, %v65_v14, %v67_v13  ;;  %v70_v42 = vsel %vm68_vm1, %v63_v11, %v65_v14  ;;  %v127_v12 = vld [vmem:[#allocation2 + $0x68] sm:$0xff]  ;;  %v128_v14 = vld [vmem:[#allocation2 + $0x70] sm:$0xff] }
  0x90   :  { %v78_v50 = vmul.f32 %v74_v34, %v72_v35  ;;  %v80_v55 = vmul.f32 %v76_v39, %v70_v42  ;;  %v81_v56 = vmul.f32 %v77_v40, %v69_v41  ;;  %v83_v34 = vadd.f32 %v79_v54, %v57_v6  ;;  %v142_v40 = vld [vmem:[#allocation2 + $0x98] sm:$0xff]  ;;  %v140_v41 = vld [vmem:[#allocation2 + $0x88] sm:$0xff]  ;;  %v141_v42 = vld [vmem:[#allocation2 + $0x90] sm:$0xff] }
  0x91   :  { %v146_v49 = vmul.f32 %v995_v3, %v142_v40  ;;  %v193_v6 = vld [vmem:[#allocation2 + $0xd0] sm:$0xff]  ;;  %v243_v40 = vld [vmem:[#allocation2 + $0x100] sm:$0xff] }
  0x92   :  { %v89_v15 = vpop.permute.xlu1 %88  ;;  %v87_v16 = vpop.permute.xlu0 %86  ;;  %v82_v11 = vadd.f32 %v78_v50, %v56_v46  ;;  %v84_v35 = vadd.f32 %v80_v55, %v58_v7  ;;  %v85_v36 = vadd.f32 %v81_v56, %v59_v53  ;;  %v144_v50 = vmul.f32 %v140_v41, %v1000_v4  ;;  %v165_v55 = vld [vmem:[#allocation2 + $0xa0] sm:$0xff]  ;;  %v167_v4 = vld [vmem:[#allocation2 + $0xb0] sm:$0xff] }
  0x93   :  { %v97_v58 = vsel %vm94_vm2, %v87_v16, %v89_v15 }
  0x96   :  { %v93_v17 = vpop.permute.xlu1 %92  ;;  %v91_v18 = vpop.permute.xlu0 %90 }
  0x97   :  { %v98_v52 = vsel %vm94_vm2, %v93_v17, %v87_v16  ;;  %v95_v61 = vsel %vm94_vm2, %v91_v18, %v93_v17  ;;  %v96_v62 = vsel %vm94_vm2, %v89_v15, %v91_v18  ;;  %v129_v16 = vld [vmem:[#allocation2 + $0x78] sm:$0xff]  ;;  %v105_v18 = vmul.f32 %v101_v57, %v97_v58 }
  0x98   :  { %v104_v8 = vmul.f32 %v100_v51, %v98_v52  ;;  %v106_v23 = vmul.f32 %v102_v59, %v96_v62  ;;  %v107_v31 = vmul.f32 %v103_v60, %v95_v61  ;;  %v145_v51 = vmul.f32 %v981_v1, %v141_v42  ;;  %v168_v58 = vld [vmem:[#allocation2 + $0xb8] sm:$0xff]  ;;  %v166_v1 = vld [vmem:[#allocation2 + $0xa8] sm:$0xff]  ;;  %v191_v62 = vld [vmem:[#allocation2 + $0xc0] sm:$0xff] }
  0x99   :  { %v246_v42 = vld [vmem:[#allocation2 + $0x118] sm:$0xff] }
  0x9a   :  { %v115_v19 = vpop.permute.xlu1 %114  ;;  %v113_v20 = vpop.permute.xlu0 %112  ;;  %v108_v37 = vadd.f32 %v104_v8, %v82_v11  ;;  %v110_v46 = vadd.f32 %v106_v23, %v84_v35  ;;  %v111_v47 = vadd.f32 %v107_v31, %v85_v36  ;;  %v217_v23 = vld [vmem:[#allocation2 + $0xe0] sm:$0xff] }
  0x9b   :  { %v123_v13 = vsel %vm120_vm3, %v113_v20, %v115_v19 }
  0x9c   :  { %v131_v38 = vmul.f32 %v127_v12, %v123_v13 }
  0x9e   :  { %v119_v21 = vpop.permute.xlu1 %118  ;;  %v117_v22 = vpop.permute.xlu0 %116 }
  0x9f   :  { %v124_v5 = vsel %vm120_vm3, %v119_v21, %v113_v20  ;;  %v121_v15 = vsel %vm120_vm3, %v117_v22, %v119_v21  ;;  %v122_v17 = vsel %vm120_vm3, %v115_v19, %v117_v22  ;;  %v143_v19 = vmul.f32 %v139_v33, %v986_v2  ;;  %v218_v33 = vld [vmem:[#allocation2 + $0xe8] sm:$0xff] }
  0xa0   :  { %v130_v32 = vmul.f32 %v126_v63, %v124_v5  ;;  %v132_v39 = vmul.f32 %v128_v14, %v122_v17  ;;  %v133_v20 = vmul.f32 %v129_v16, %v121_v15  ;;  %v109_v22 = vadd.f32 %v105_v18, %v83_v34  ;;  %v194_v63 = vld [vmem:[#allocation2 + $0xd8] sm:$0xff]  ;;  %v192_v5 = vld [vmem:[#allocation2 + $0xc8] sm:$0xff]  ;;  %v219_v34 = vld [vmem:[#allocation2 + $0xf0] sm:$0xff] }
  0xa2   :  { %v1068_v24 = vpop.permute.xlu1 %153  ;;  %v1070_v25 = vpop.permute.xlu0 %151  ;;  %v134_v48 = vadd.f32 %v130_v32, %v108_v37  ;;  %v135_v52 = vadd.f32 %v131_v38, %v109_v22  ;;  %v136_v53 = vadd.f32 %v132_v39, %v110_v46  ;;  %v137_v54 = vadd.f32 %v133_v20, %v111_v47  ;;  %v245_v22 = vld [vmem:[#allocation2 + $0x110] sm:$0xff] }
  0xa3   :  { %v162_v2 = vsel %vm159_vm4, %v1070_v25, %v1068_v24 }
  0xa4   :  { %v147_v61 = vadd.f32 %v143_v19, %v134_v48  ;;  %v169_v7 = vmul.f32 %v165_v55, %v162_v2  ;;  %v150_v13 = vadd.f32 %v146_v49, %v137_v54  ;;  %v148_v14 = vadd.f32 %v144_v50, %v135_v52  ;;  %v244_v19 = vld [vmem:[#allocation2 + $0x108] sm:$0xff] }
  0xa5   :  { %v149_v16 = vadd.f32 %v145_v51, %v136_v53 }
  0xa6   :  { %v1074_v27 = vpop.permute.xlu1 %157  ;;  %v1076_v28 = vpop.permute.xlu0 %155  ;;  %v173_v37 = vadd.f32 %v169_v7, %v147_v61 }
  0xa7   :  { %v163_v3 = vsel %vm159_vm4, %v1074_v27, %v1070_v25  ;;  %v160_v59 = vsel %vm159_vm4, %v1076_v28, %v1074_v27  ;;  %v161_v60 = vsel %vm159_vm4, %v1068_v24, %v1076_v28 }
  0xa8   :  { %v172_v8 = vmul.f32 %v168_v58, %v163_v3  ;;  %v170_v11 = vmul.f32 %v166_v1, %v161_v60  ;;  %v171_v12 = vmul.f32 %v167_v4, %v160_v59 }
  0xaa   :  { %v1080_v29 = vpop.permute.xlu1 %179  ;;  %v1082_v30 = vpop.permute.xlu0 %177  ;;  %v176_v38 = vadd.f32 %v172_v8, %v150_v13  ;;  %v174_v39 = vadd.f32 %v170_v11, %v148_v14  ;;  %v175_v20 = vadd.f32 %v171_v12, %v149_v16  ;;  %v269_v16 = vld [vmem:[%s1431_s2] sm:$0xf] }
  0xab   :  { %v188_v25 = vsel %vm185_vm5, %v1082_v30, %v1080_v29 }
  0xae   :  { %v1100_v44 = vpop.permute.xlu1 %183  ;;  %v1102_v45 = vpop.permute.xlu0 %181 }
  0xaf   :  { %v189_v27 = vsel %vm185_vm5, %v1100_v44, %v1082_v30  ;;  %v186_v24 = vsel %vm185_vm5, %v1102_v45, %v1100_v44  ;;  %v187_v28 = vsel %vm185_vm5, %v1080_v29, %v1102_v45  ;;  %v195_v30 = vmul.f32 %v191_v62, %v188_v25  ;;  %v220_v45 = vld [vmem:[#allocation2 + $0xf8] sm:$0xff] }
  0xb0   :  { %v198_v15 = vmul.f32 %v194_v63, %v189_v27  ;;  %v196_v17 = vmul.f32 %v192_v5, %v187_v28  ;;  %v197_v18 = vmul.f32 %v193_v6, %v186_v24 }
  0xb1   :  { %v199_v49 = vadd.f32 %v195_v30, %v173_v37 }
  0xb2   :  { %v1116_v9 = vpop.permute.xlu1 %205  ;;  %v1118_v10 = vpop.permute.xlu0 %203  ;;  %v202_v50 = vadd.f32 %v198_v15, %v176_v38  ;;  %v200_v51 = vadd.f32 %v196_v17, %v174_v39  ;;  %v201_v52 = vadd.f32 %v197_v18, %v175_v20  ;;  %v877_v20 = vld [vmem:[%s1432_s3 + $0x20] sm:$0xff] }
  0xb3   :  { %v214_v29 = vsel %vm211_vm6, %v1118_v10, %v1116_v9 }
  0xb6   :  { %v210_v43 = vpop.permute.xlu1 %209  ;;  %v208_v21 = vpop.permute.xlu0 %207 }
  0xb7   :  { %v215_v32 = vsel %vm211_vm6, %v210_v43, %v1118_v10  ;;  %v212_v35 = vsel %vm211_vm6, %v208_v21, %v210_v43  ;;  %v213_v36 = vsel %vm211_vm6, %v1116_v9, %v208_v21  ;;  %v221_v21 = vmul.f32 %v217_v23, %v214_v29 }
  0xb8   :  { %v224_v46 = vmul.f32 %v220_v45, %v215_v32  ;;  %v222_v47 = vmul.f32 %v218_v33, %v213_v36  ;;  %v223_v48 = vmul.f32 %v219_v34, %v212_v35 }
  0xb9   :  { %v225_v2 = vadd.f32 %v221_v21, %v199_v49 }
  0xba   :  { %v232_v56 = vpop.permute.xlu1 %231  ;;  %v230_v57 = vpop.permute.xlu0 %229  ;;  %v228_v58 = vadd.f32 %v224_v46, %v202_v50  ;;  %v226_v3 = vadd.f32 %v222_v47, %v200_v51  ;;  %v227_v1 = vadd.f32 %v223_v48, %v201_v52 }
  0xbb   :  { %v240_v41 = vsel %vm237_vm7, %v230_v57, %v232_v56 }
  0xbc   :  { %v247_v53 = vmul.f32 %v243_v40, %v240_v41  ;;  %v879_v40 = vld [vmem:[%s1432_s3 + $0x30] sm:$0xff]  ;;  %v886_v41 = vld [vmem:[%s1432_s3 + $0x40] sm:$0xff] }
  0xbe   :  { %v236_v44 = vpop.permute.xlu1 %235  ;;  %v234_v31 = vpop.permute.xlu0 %233  ;;  %v251_v4 = vadd.f32 %v247_v53, %v225_v2 }
  0xbf   :  { %v241_v10 = vsel %vm237_vm7, %v236_v44, %v230_v57  ;;  %v238_v43 = vsel %vm237_vm7, %v234_v31, %v236_v44  ;;  %v239_v9 = vsel %vm237_vm7, %v232_v56, %v234_v31 }
  0xc0   :  { %v250_v54 = vmul.f32 %v246_v42, %v241_v10  ;;  %v248_v55 = vmul.f32 %v244_v19, %v239_v9  ;;  %v249_v57 = vmul.f32 %v245_v22, %v238_v43  ;;  %v887_v42 = vld [vmem:[%s1432_s3 + $0x48] sm:$0xff] }
  0xc2   :  { %v253_v59 = vadd.f32 %v249_v57, %v227_v1  ;;  %v252_v60 = vadd.f32 %v248_v55, %v226_v3  ;;  %v254_v56 = vadd.f32 %v250_v54, %v228_v58 }
  0xcb   :  { %v259_v61 = vpop.permute.xlu0 %258  ;;  %v279_v30 = vpop.permute.xlu1 %278 }
  0xcc   :  { %v262_v62 = vadd.f32 %v259_v61, %v252_v60  ;;  %v264_v25 = vadd.f32 %v259_v61, %v254_v56  ;;  %v261_v63 = vadd.f32 %v259_v61, %v251_v4  ;;  %v263_v27 = vadd.f32 %v259_v61, %v253_v59  ;;  %v397_v4 = vld [vmem:[#allocation2 + $0x120] sm:$0xff] }
  0xcd   :  { %v418_v59 = vld [vmem:[#allocation2 + $0x140] sm:$0xff] }
  0xce   :  { %v266_v5 = vmax.f32 %v262_v62, 0.0  ;;  %v268_v6 = vmax.f32 %v264_v25, 0.0  ;;  %v265_v24 = vmax.f32 %v261_v63, 0.0  ;;  %v267_v28 = vmax.f32 %v263_v27, 0.0  ;;  %v419_v62 = vld [vmem:[#allocation2 + $0x148] sm:$0xff]  ;;  %v420_v63 = vld [vmem:[#allocation2 + $0x150] sm:$0xff] }
  0xd0   :  { %v273_v7 = vpack.c.bf16 %v266_v5, %v266_v5  ;;  %v275_v8 = vpack.c.bf16 %v268_v6, %v268_v6  ;;  %v272_v11 = vpack.c.bf16 %v265_v24, %v265_v24  ;;  %v274_v12 = vpack.c.bf16 %v267_v28, %v267_v28  ;;  %v421_v5 = vld [vmem:[#allocation2 + $0x158] sm:$0xff]  ;;  %v398_v24 = vld [vmem:[#allocation2 + $0x128] sm:$0xff] }
  0xd2   :  { %873 = vmatprep.subr.msk.bf16.mxu0 %vm285_vm8, %v273_v7  ;;  %875 = vmatprep.subr.msk.bf16.mxu1 %vm285_vm8, %v275_v8  ;;  %v287_v13 = vsel %vm285_vm8, %v272_v11, 0  ;;  %v293_v14 = vsel %vm285_vm8, %v274_v12, 0  ;;  %v399_v8 = vld [vmem:[#allocation2 + $0x130] sm:$0xff]  ;;  %v400_v12 = vld [vmem:[#allocation2 + $0x138] sm:$0xff] }
  0xd3   :  { %313 = vmatpush1.bf16.msra.mxu0 %v287_v13  ;;  %354 = vmatpush1.bf16.msra.mxu1 %v293_v14 }
  0xd6   :  { %874 = vmatmul.mubr.msk.bf16.vlgmr.msra.gmra.mxu0 %vm281_vm9, %v269_v16  ;;  %876 = vmatmul.mubr.msk.bf16.vlgmr.msra.gmra.mxu1 %vm281_vm9, %v269_v16  ;;  %v443_v16 = vld [vmem:[#allocation2 + $0x160] sm:$0xff] }
  0xd7   :  { %668 = vmatprep.mubr.bf16.mxu0 %v937_v0  ;;  %709 = vmatprep.mubr.bf16.mxu1 %v937_v0 }
 0x196   :  { %v332_v15 = vpop.f32.mrf.mxu0  ;;  %v373_v17 = vpop.f32.mrf.mxu1 }
 0x197   :  { %v333_v18 = vadd.f32 %v332_v15, %v279_v30  ;;  %v374_v29 = vadd.f32 %v373_v17, %v279_v30 }
 0x198   :  { %v334_v23 = vpop.f32.mrf.mxu0  ;;  %v375_v44 = vpop.f32.mrf.mxu1 }
 0x199   :  { %v1197_v31 = vmax.f32 %v333_v18, 0.0  ;;  %v335_v45 = vadd.f32 %v334_v23, %v279_v30  ;;  %v376_v35 = vadd.f32 %v375_v44, %v279_v30  ;;  %v1203_v38 = vmax.f32 %v374_v29, 0.0  ;;  %v444_v44 = vld [vmem:[#allocation2 + $0x168] sm:$0xff] }
 0x19a   :  { %v336_v32 = vpop.f32.mrf.mxu0  ;;  %v377_v33 = vpop.f32.mrf.mxu1 }
 0x19b   :  { %v1199_v34 = vmax.f32 %v335_v45, 0.0  ;;  %384 = vrot.lane.b32.xlu1 %v1197_v31, %s938_s1  ;;  %v1207_v39 = vmax.f32 %v376_v35, 0.0  ;;  %v445_v32 = vld [vmem:[#allocation2 + $0x170] sm:$0xff]  ;;  %v446_v35 = vld [vmem:[#allocation2 + $0x178] sm:$0xff] }
 0x19c   :  { %v337_v36 = vpop.f32.mrf.mxu0  ;;  %v378_v37 = vpop.f32.mrf.mxu1 }
 0x19d   :  { %386 = vrot.lane.b32.xlu0 %v1199_v34, %s938_s1  ;;  %v468_v37 = vld [vmem:[#allocation2 + $0x180] sm:$0xff] }
 0x19f   :  { %388 = vrot.lane.b32.xlu1 %v1203_v38, %s938_s1 }
 0x1a1   :  { %390 = vrot.lane.b32.xlu0 %v1207_v39, %s938_s1 }
 0x1a3   :  { %405 = vrot.lane.b32.xlu1 %v1197_v31, %s939_s30 }
 0x1a5   :  { %407 = vrot.lane.b32.xlu0 %v1199_v34, %s939_s30 }
 0x1a7   :  { %409 = vrot.lane.b32.xlu1 %v1203_v38, %s939_s30 }
 0x1a9   :  { %411 = vrot.lane.b32.xlu0 %v1207_v39, %s939_s30 }
 0x1ab   :  { %430 = vrot.lane.b32.xlu1 %v1197_v31, %s940_s0 }
 0x1ad   :  { %432 = vrot.lane.b32.xlu0 %v1199_v34, %s940_s0 }
 0x1af   :  { %434 = vrot.lane.b32.xlu1 %v1203_v38, %s940_s0 }
 0x1b1   :  { %436 = vrot.lane.b32.xlu0 %v1207_v39, %s940_s0 }
 0x1b3   :  { %455 = vrot.lane.b32.xlu1 %v1197_v31, %s941_s5 }
 0x1b5   :  { %457 = vrot.lane.b32.xlu0 %v1199_v34, %s941_s5 }
 0x1b7   :  { %459 = vrot.lane.b32.xlu1 %v1203_v38, %s941_s5 }
 0x1b9   :  { %461 = vrot.lane.b32.xlu0 %v1207_v39, %s941_s5 }
 0x1bb   :  { %493 = vrot.lane.b32.xlu1 %v1197_v31, %s942_s6 }
 0x1bd   :  { %495 = vrot.lane.b32.xlu0 %v1199_v34, %s942_s6 }
 0x1bf   :  { %497 = vrot.lane.b32.xlu1 %v1203_v38, %s942_s6 }
 0x1c1   :  { %499 = vrot.lane.b32.xlu0 %v1207_v39, %s942_s6 }
 0x1c3   :  { %518 = vrot.lane.b32.xlu1 %v1197_v31, %s943_s7 }
 0x1c5   :  { %520 = vrot.lane.b32.xlu0 %v1199_v34, %s943_s7 }
 0x1c7   :  { %522 = vrot.lane.b32.xlu1 %v1203_v38, %s943_s7 }
 0x1c9   :  { %524 = vrot.lane.b32.xlu0 %v1207_v39, %s943_s7 }
 0x1cb   :  { %543 = vrot.lane.b32.xlu1 %v1197_v31, %s944_s8 }
 0x1cd   :  { %545 = vrot.lane.b32.xlu0 %v1199_v34, %s944_s8 }
 0x1cf   :  { %547 = vrot.lane.b32.xlu1 %v1203_v38, %s944_s8 }
 0x1d1   :  { %549 = vrot.lane.b32.xlu0 %v1207_v39, %s944_s8 }
 0x1d3   :  { %568 = vrot.lane.b32.xlu1 %v1197_v31, %s945_s9 }
 0x1d5   :  { %570 = vrot.lane.b32.xlu0 %v1199_v34, %s945_s9 }
 0x1d7   :  { %572 = vrot.lane.b32.xlu1 %v1203_v38, %s945_s9 }
 0x1d9   :  { %574 = vrot.lane.b32.xlu0 %v1207_v39, %s945_s9 }
 0x1db   :  { %597 = vperm.xlu1 %910, %v877_v20  }
 0x1dd   :  { %618 = vperm.xlu0 %909, %v879_v40  }
 0x1df   :  { %734 = vperm.xlu1 %910, %v886_v41  }
 0x1e1   :  { %739 = vperm.xlu0 %909, %v887_v42  }
 0x20d   :  { %v385_v10 = vpop.permute.xlu1 %384 }
 0x20f   :  { %v387_v19 = vpop.permute.xlu0 %386 }
 0x210   :  { %v394_v28 = vsel %vm47_vm0, %v385_v10, %v387_v19 }
 0x211   :  { %v389_v22 = vpop.permute.xlu1 %388  ;;  %v402_v40 = vmul.f32 %v398_v24, %v394_v28 }
 0x212   :  { %v393_v11 = vsel %vm47_vm0, %v387_v19, %v389_v22 }
 0x213   :  { %v391_v43 = vpop.permute.xlu0 %390  ;;  %v403_v41 = vmul.f32 %v399_v8, %v393_v11 }
 0x214   :  { %v395_v61 = vsel %vm47_vm0, %v391_v43, %v385_v10  ;;  %v392_v13 = vsel %vm47_vm0, %v389_v22, %v391_v43  ;;  %v469_v43 = vld [vmem:[#allocation2 + $0x188] sm:$0xff] }
 0x215   :  { %v406_v9 = vpop.permute.xlu1 %405  ;;  %v401_v15 = vmul.f32 %v397_v4, %v395_v61  ;;  %v404_v42 = vmul.f32 %v400_v12, %v392_v13  ;;  %v484_v12 = vld [vmem:[#allocation2 + $0x1b8] sm:$0xff] }
 0x217   :  { %v408_v21 = vpop.permute.xlu0 %407 }
 0x218   :  { %v415_v25 = vsel %vm68_vm1, %v406_v9, %v408_v21 }
 0x219   :  { %v410_v46 = vpop.permute.xlu1 %409  ;;  %v423_v17 = vmul.f32 %v419_v62, %v415_v25 }
 0x21a   :  { %v414_v27 = vsel %vm68_vm1, %v408_v21, %v410_v46  ;;  %v470_v21 = vld [vmem:[#allocation2 + $0x190] sm:$0xff] }
 0x21b   :  { %v412_v47 = vpop.permute.xlu0 %411  ;;  %v424_v18 = vmul.f32 %v420_v63, %v414_v27 }
 0x21c   :  { %v416_v60 = vsel %vm68_vm1, %v412_v47, %v406_v9  ;;  %v413_v6 = vsel %vm68_vm1, %v410_v46, %v412_v47  ;;  %v471_v47 = vld [vmem:[#allocation2 + $0x198] sm:$0xff] }
 0x21d   :  { %v431_v48 = vpop.permute.xlu1 %430  ;;  %v422_v14 = vmul.f32 %v418_v59, %v416_v60  ;;  %v425_v23 = vmul.f32 %v421_v5, %v413_v6  ;;  %v427_v60 = vadd.f32 %v423_v17, %v402_v40  ;;  %v428_v61 = vadd.f32 %v424_v18, %v403_v41  ;;  %v481_v6 = vld [vmem:[#allocation2 + $0x1a0] sm:$0xff] }
 0x21f   :  { %v433_v49 = vpop.permute.xlu0 %432  ;;  %v426_v22 = vadd.f32 %v422_v14, %v401_v15  ;;  %v429_v62 = vadd.f32 %v425_v23, %v404_v42  ;;  %v485_v15 = vmul.f32 %v481_v6, %v1197_v31  ;;  %v507_v23 = vld [vmem:[#allocation2 + $0x1c8] sm:$0xff]  ;;  %v534_v42 = vld [vmem:[#allocation2 + $0x1f8] sm:$0xff] }
 0x220   :  { %v440_v45 = vsel %vm94_vm2, %v431_v48, %v433_v49 }
 0x221   :  { %v435_v50 = vpop.permute.xlu1 %434 }
 0x222   :  { %v439_v33 = vsel %vm94_vm2, %v433_v49, %v435_v50  ;;  %v448_v49 = vmul.f32 %v444_v44, %v440_v45  ;;  %v508_v45 = vld [vmem:[#allocation2 + $0x1d0] sm:$0xff] }
 0x223   :  { %v437_v51 = vpop.permute.xlu0 %436 }
 0x224   :  { %v441_v30 = vsel %vm94_vm2, %v437_v51, %v431_v48  ;;  %v438_v36 = vsel %vm94_vm2, %v435_v50, %v437_v51  ;;  %v449_v50 = vmul.f32 %v445_v32, %v439_v33  ;;  %v452_v24 = vadd.f32 %v448_v49, %v427_v60  ;;  %v509_v32 = vld [vmem:[#allocation2 + $0x1d8] sm:$0xff]  ;;  %v557_v60 = vld [vmem:[#allocation2 + $0x208] sm:$0xff] }
 0x225   :  { %v456_v52 = vpop.permute.xlu1 %455  ;;  %v447_v10 = vmul.f32 %v443_v16, %v441_v30  ;;  %v450_v51 = vmul.f32 %v446_v35, %v438_v36  ;;  %v506_v30 = vld [vmem:[#allocation2 + $0x1c0] sm:$0xff] }
 0x227   :  { %v458_v53 = vpop.permute.xlu0 %457  ;;  %v451_v25 = vadd.f32 %v447_v10, %v426_v22  ;;  %v454_v28 = vadd.f32 %v450_v51, %v429_v62 }
 0x228   :  { %v465_v9 = vsel %vm120_vm3, %v456_v52, %v458_v53 }
 0x229   :  { %v460_v54 = vpop.permute.xlu1 %459  ;;  %v473_v63 = vmul.f32 %v469_v43, %v465_v9 }
 0x22a   :  { %v464_v46 = vsel %vm120_vm3, %v458_v53, %v460_v54  ;;  %v453_v53 = vadd.f32 %v449_v50, %v428_v61  ;;  %v556_v50 = vld [vmem:[#allocation2 + $0x200] sm:$0xff]  ;;  %v559_v61 = vld [vmem:[#allocation2 + $0x218] sm:$0xff] }
 0x22b   :  { %v462_v55 = vpop.permute.xlu0 %461  ;;  %v474_v27 = vmul.f32 %v470_v21, %v464_v46  ;;  %v477_v13 = vadd.f32 %v473_v63, %v452_v24  ;;  %v581_v24 = vld [vmem:[#allocation2 + $0x220] sm:$0xff] }
 0x22c   :  { %v466_v20 = vsel %vm120_vm3, %v462_v55, %v456_v52  ;;  %v463_v48 = vsel %vm120_vm3, %v460_v54, %v462_v55  ;;  %v482_v54 = vld [vmem:[#allocation2 + $0x1a8] sm:$0xff]  ;;  %v483_v55 = vld [vmem:[#allocation2 + $0x1b0] sm:$0xff] }
 0x22d   :  { %v1281_v57 = vpop.permute.xlu1 %493  ;;  %v472_v4 = vmul.f32 %v468_v37, %v466_v20  ;;  %v475_v52 = vmul.f32 %v471_v47, %v463_v48  ;;  %v478_v14 = vadd.f32 %v474_v27, %v453_v53  ;;  %v486_v36 = vmul.f32 %v482_v54, %v1199_v34  ;;  %v584_v54 = vld [vmem:[#allocation2 + $0x238] sm:$0xff] }
 0x22e   :  { %v487_v37 = vmul.f32 %v483_v55, %v1203_v38  ;;  %v488_v20 = vmul.f32 %v484_v12, %v1207_v39 }
 0x22f   :  { %v1283_v2 = vpop.permute.xlu0 %495  ;;  %v476_v8 = vadd.f32 %v472_v4, %v451_v25  ;;  %v479_v16 = vadd.f32 %v475_v52, %v454_v28  ;;  %v490_v9 = vadd.f32 %v486_v36, %v477_v13  ;;  %v582_v28 = vld [vmem:[#allocation2 + $0x228] sm:$0xff] }
 0x230   :  { %v503_v18 = vsel %vm159_vm4, %v1281_v57, %v1283_v2  ;;  %v491_v21 = vadd.f32 %v487_v37, %v478_v14 }
 0x231   :  { %v1285_v58 = vpop.permute.xlu1 %497  ;;  %v489_v35 = vadd.f32 %v485_v15, %v476_v8  ;;  %v510_v39 = vmul.f32 %v506_v30, %v503_v18  ;;  %v492_v46 = vadd.f32 %v488_v20, %v479_v16  ;;  %v583_v8 = vld [vmem:[#allocation2 + $0x230] sm:$0xff] }
 0x232   :  { %v502_v44 = vsel %vm159_vm4, %v1283_v2, %v1285_v58  ;;  %v531_v2 = vld [vmem:[#allocation2 + $0x1e0] sm:$0xff] }
 0x233   :  { %v1287_v3 = vpop.permute.xlu0 %499  ;;  %v511_v10 = vmul.f32 %v507_v23, %v502_v44  ;;  %v514_v63 = vadd.f32 %v510_v39, %v489_v35 }
 0x234   :  { %v501_v33 = vsel %vm159_vm4, %v1285_v58, %v1287_v3  ;;  %v504_v31 = vsel %vm159_vm4, %v1287_v3, %v1281_v57  ;;  %v532_v58 = vld [vmem:[#allocation2 + $0x1e8] sm:$0xff]  ;;  %v533_v3 = vld [vmem:[#allocation2 + $0x1f0] sm:$0xff] }
 0x235   :  { %v1289_v1 = vpop.permute.xlu1 %518  ;;  %v512_v22 = vmul.f32 %v508_v45, %v501_v33  ;;  %v513_v43 = vmul.f32 %v509_v32, %v504_v31  ;;  %v515_v27 = vadd.f32 %v511_v10, %v490_v9 }
 0x237   :  { %v1293_v56 = vpop.permute.xlu0 %520  ;;  %v516_v52 = vadd.f32 %v512_v22, %v491_v21  ;;  %v517_v6 = vadd.f32 %v513_v43, %v492_v46  ;;  %v878_v21 = vld [vmem:[%s1431_s2 + $0x8] sm:$0xf] }
 0x238   :  { %v528_v41 = vsel %vm185_vm5, %v1289_v1, %v1293_v56 }
 0x239   :  { %v1305_v7 = vpop.permute.xlu1 %522 }
 0x23a   :  { %v527_v57 = vsel %vm185_vm5, %v1293_v56, %v1305_v7  ;;  %v535_v56 = vmul.f32 %v531_v2, %v528_v41 }
 0x23b   :  { %v1313_v29 = vpop.permute.xlu0 %524  ;;  %v536_v47 = vmul.f32 %v532_v58, %v527_v57 }
 0x23c   :  { %v526_v34 = vsel %vm185_vm5, %v1305_v7, %v1313_v29  ;;  %v529_v38 = vsel %vm185_vm5, %v1313_v29, %v1289_v1  ;;  %v558_v29 = vld [vmem:[#allocation2 + $0x210] sm:$0xff]  ;;  %v539_v14 = vadd.f32 %v535_v56, %v514_v63 }
 0x23d   :  { %v1323_v19 = vpop.permute.xlu1 %543  ;;  %v537_v48 = vmul.f32 %v533_v3, %v526_v34  ;;  %v538_v49 = vmul.f32 %v534_v42, %v529_v38  ;;  %v540_v16 = vadd.f32 %v536_v47, %v515_v27 }
 0x23f   :  { %v546_v59 = vpop.permute.xlu0 %545  ;;  %v541_v30 = vadd.f32 %v537_v48, %v516_v52  ;;  %v542_v15 = vadd.f32 %v538_v49, %v517_v6 }
 0x240   :  { %v553_v7 = vsel %vm211_vm6, %v1323_v19, %v546_v59 }
 0x241   :  { %v548_v5 = vpop.permute.xlu1 %547 }
 0x242   :  { %v552_v1 = vsel %vm211_vm6, %v546_v59, %v548_v5 }
 0x243   :  { %v550_v11 = vpop.permute.xlu0 %549  ;;  %v561_v55 = vmul.f32 %v557_v60, %v552_v1 }
 0x244   :  { %v551_v62 = vsel %vm211_vm6, %v548_v5, %v550_v11  ;;  %v554_v25 = vsel %vm211_vm6, %v550_v11, %v1323_v19  ;;  %v560_v11 = vmul.f32 %v556_v50, %v553_v7 }
 0x245   :  { %v569_v17 = vpop.permute.xlu1 %568  ;;  %v562_v12 = vmul.f32 %v558_v29, %v551_v62  ;;  %v563_v13 = vmul.f32 %v559_v61, %v554_v25  ;;  %v565_v33 = vadd.f32 %v561_v55, %v540_v16 }
 0x246   :  { %v564_v32 = vadd.f32 %v560_v11, %v539_v14 }
 0x247   :  { %v571_v40 = vpop.permute.xlu0 %570  ;;  %v566_v31 = vadd.f32 %v562_v12, %v541_v30  ;;  %v567_v35 = vadd.f32 %v563_v13, %v542_v15 }
 0x248   :  { %v578_v53 = vsel %vm237_vm7, %v569_v17, %v571_v40 }
 0x249   :  { %v573_v51 = vpop.permute.xlu1 %572  ;;  %v585_v18 = vmul.f32 %v581_v24, %v578_v53 }
 0x24a   :  { %v577_v59 = vsel %vm237_vm7, %v571_v40, %v573_v51 }
 0x24b   :  { %v575_v4 = vpop.permute.xlu0 %574  ;;  %v586_v23 = vmul.f32 %v582_v28, %v577_v59  ;;  %v589_v36 = vadd.f32 %v585_v18, %v564_v32  ;;  %v911_v59 = vld [vmem:[%s1431_s2 + $0x10] sm:$0xff]  }
 0x24c   :  { %v576_v5 = vsel %vm237_vm7, %v573_v51, %v575_v4  ;;  %v579_v19 = vsel %vm237_vm7, %v575_v4, %v569_v17 }
 0x24d   :  { %v587_v44 = vmul.f32 %v583_v8, %v576_v5  ;;  %v588_v45 = vmul.f32 %v584_v54, %v579_v19  ;;  %v590_v37 = vadd.f32 %v586_v23, %v565_v33 }
 0x24f   :  { %v591_v26 = vadd.f32 %v587_v44, %v566_v31  ;;  %v592_v17 = vadd.f32 %v588_v45, %v567_v35 }
 0x256   :  { %v598_v20 = vpop.permute.xlu1 %597 }
 0x257   :  { %v600_v2 = vadd.f32 %v598_v20, %v589_v36  ;;  %v601_v40 = vadd.f32 %v598_v20, %v590_v37  ;;  %v602_v41 = vadd.f32 %v598_v20, %v591_v26  ;;  %v603_v58 = vadd.f32 %v598_v20, %v592_v17 }
 0x258   :  { %v619_v46 = vpop.permute.xlu0 %618 }
 0x259   :  { %v605_v57 = vmax.f32 %v601_v40, 0.0  ;;  %v607_v3 = vmax.f32 %v603_v58, 0.0  ;;  %v604_v42 = vmax.f32 %v600_v2, 0.0  ;;  %v606_v34 = vmax.f32 %v602_v41, 0.0 }
 0x25a   :  { %v735_v8 = vpop.permute.xlu1 %734 }
 0x25b   :  { %v613_v38 = vpack.c.bf16 %v605_v57, %v605_v57  ;;  %v615_v39 = vpack.c.bf16 %v607_v3, %v607_v3  ;;  %v612_v10 = vpack.c.bf16 %v604_v42, %v604_v42  ;;  %v614_v22 = vpack.c.bf16 %v606_v34, %v606_v34 }
 0x25c   :  { %v740_v13 = vpop.permute.xlu0 %739 }
 0x25d   :  { %880 = vmatprep.subr.msk.bf16.mxu0 %vm285_vm8, %v613_v38  ;;  %882 = vmatprep.subr.msk.bf16.mxu1 %vm285_vm8, %v615_v39  ;;  %v625_v43 = vsel %vm285_vm8, %v612_v10, 0  ;;  %v631_v9 = vsel %vm285_vm8, %v614_v22, 0 }
 0x25e   :  { %651 = vmatpush1.bf16.msra.mxu0 %v625_v43  ;;  %692 = vmatpush1.bf16.msra.mxu1 %v631_v9 }
 0x261   :  { %881 = vmatmul.mubr.msk.bf16.vlgmr.msra.gmra.mxu0 %vm281_vm9, %v878_v21  ;;  %883 = vmatmul.mubr.msk.bf16.vlgmr.msra.gmra.mxu1 %vm281_vm9, %v878_v21 }
 0x262   :  { %794 = vmatprep.mubr.bf16.mxu0 %v937_v0  ;;  %837 = vmatprep.mubr.bf16.mxu1 %v937_v0 }
 0x321   :  { %v670_v56 = vpop.f32.mrf.mxu0  ;;  %v711_v47 = vpop.f32.mrf.mxu1 }
 0x322   :  { %v671_v48 = vadd.f32 %v670_v56, %v619_v46  ;;  %v712_v49 = vadd.f32 %v711_v47, %v619_v46 }
 0x323   :  { %v672_v50 = vpop.f32.mrf.mxu0  ;;  %v713_v51 = vpop.f32.mrf.mxu1 }
 0x324   :  { %v718_v4 = vmax.f32 %v671_v48, 0.0  ;;  %v720_v7 = vmax.f32 %v712_v49, 0.0  ;;  %v673_v60 = vadd.f32 %v672_v50, %v619_v46  ;;  %v714_v1 = vadd.f32 %v713_v51, %v619_v46 }
 0x325   :  { %v674_v29 = vpop.f32.mrf.mxu0  ;;  %v715_v61 = vpop.f32.mrf.mxu1 }
 0x326   :  { %v728_v62 = vpack.c.bf16 %v718_v4, %v718_v4  ;;  %v730_v25 = vpack.c.bf16 %v720_v7, %v720_v7  ;;  %v719_v63 = vmax.f32 %v673_v60, 0.0  ;;  %v721_v27 = vmax.f32 %v714_v1, 0.0 }
 0x327   :  { %v675_v52 = vpop.f32.mrf.mxu0  ;;  %v716_v6 = vpop.f32.mrf.mxu1 }
 0x328   :  { %v729_v0 = vpack.c.bf16 %v719_v63, %v719_v63  ;;  %v731_v24 = vpack.c.bf16 %v721_v27, %v721_v27  ;;  %v751_v53 = vsel %vm285_vm8, %v728_v62, 0  ;;  %v757_v28 = vsel %vm285_vm8, %v730_v25, 0 }
 0x32a   :  { %889 = vmatprep.subr.msk.bf16.mxu0 %vm285_vm8, %v729_v0  ;;  %891 = vmatprep.subr.msk.bf16.mxu1 %vm285_vm8, %v731_v24 }
 0x32b   :  { %777 = vmatpush1.bf16.msra.mxu0 %v751_v53  ;;  %820 = vmatpush1.bf16.msra.mxu1 %v757_v28 }
 0x32e   :  { %890 = vmatmul.mubr.msk.bf16.vlgmr.msra.gmra.mxu0 %vm281_vm9, %v911_v59  ;;  %892 = vmatmul.mubr.msk.bf16.vlgmr.msra.gmra.mxu1 %vm281_vm9, %v911_v59 }
 0x3ee   :  { %v796_v54 = vpop.f32.mrf.mxu0  ;;  %v839_v5 = vpop.f32.mrf.mxu1 }
 0x3ef   :  { %v797_v19 = vadd.f32 %v796_v54, %v735_v8  ;;  %v840_v11 = vadd.f32 %v839_v5, %v735_v8 }
 0x3f0   :  { %v798_v55 = vpop.f32.mrf.mxu0  ;;  %v841_v12 = vpop.f32.mrf.mxu1 }
 0x3f1   :  { %v848_v14 = vmax.f32 %v797_v19, 0.0  ;;  %v850_v16 = vmax.f32 %v840_v11, 0.0  ;;  %v799_v30 = vadd.f32 %v798_v55, %v735_v8  ;;  %v842_v15 = vadd.f32 %v841_v12, %v735_v8 }
 0x3f2   :  { %v800_v18 = vpop.f32.mrf.mxu0  ;;  %v843_v23 = vpop.f32.mrf.mxu1 }
 0x3f3   :  { %856 = vst [vmem:[%s1433_s4] sm:$0xff] %v848_v14  ;;  %893 = vst [vmem:[%s1433_s4 + $0x20] sm:$0xff] %v850_v16  ;;  %v849_v44 = vmax.f32 %v799_v30, 0.0  ;;  %v851_v45 = vmax.f32 %v842_v15, 0.0  ;;  %v801_v32 = vadd.f32 %v800_v18, %v740_v13  ;;  %v844_v33 = vadd.f32 %v843_v23, %v740_v13 }
 0x3f4   :  { %v802_v31 = vpop.f32.mrf.mxu0  ;;  %v845_v35 = vpop.f32.mrf.mxu1 }
 0x3f5   :  { %857 = vst [vmem:[%s1433_s4 + $0x8] sm:$0xff] %v849_v44  ;;  %894 = vst [vmem:[%s1433_s4 + $0x28] sm:$0xff] %v851_v45  ;;  %v852_v36 = vmax.f32 %v801_v32, 0.0  ;;  %v854_v37 = vmax.f32 %v844_v33, 0.0  ;;  %v803_v26 = vadd.f32 %v802_v31, %v740_v13  ;;  %v846_v17 = vadd.f32 %v845_v35, %v740_v13 }
 0x3f7   :  { %858 = vst [vmem:[%s1433_s4 + $0x10] sm:$0xff] %v852_v36  ;;  %895 = vst [vmem:[%s1433_s4 + $0x30] sm:$0xff] %v854_v37  ;;  %v853_v20 = vmax.f32 %v803_v26, 0.0  ;;  %v855_v2 = vmax.f32 %v846_v17, 0.0 }
 0x3f9   :  { %859 = vst [vmem:[%s1433_s4 + $0x18] sm:$0xff] %v853_v20  ;;  %896 = vst [vmem:[%s1433_s4 + $0x38] sm:$0xff] %v855_v2 }
 0x3fa   :  { %869 = vsyncpa [#allocation3], 1 }

</bundles_post_ra>
